<compile_context>
chip_gen: v5e
topology: v5e:2x2
jax: 0.10.0
libtpu: 0.0.40
codegen_flags: <defaults>
</compile_context>

<pallas_src>
import functools

import jax
import jax.numpy as jnp
from jax.experimental import pallas as pl
from jax.experimental.pallas import tpu as pltpu


def _round_up(x, m):
    return (x + m - 1) // m * m


def _head_kernel(x_ref, w1_ref, b1_ref, w2_ref, b2_ref, o_ref):
    # x_ref:  [TB, H]   f32  (CLS rows, DMA'd straight out of features)
    # w1_ref: [H, H]    bf16 (resident, single-buffered)
    # b1_ref: [1, H]    f32
    # w2_ref: [H, OP]   bf16 (zero-padded to lane-dense OP, resident)
    # b2_ref: [1, OP]   f32  (zero-padded, resident)
    # o_ref:  [TB, OP]  f32
    x = x_ref[...].astype(jnp.bfloat16)

    # dense: x @ W1 (bf16 MXU, f32 accumulate) + b1, tanh in f32 (VPU add, EUP tanh)
    h = jnp.dot(x, w1_ref[...], preferred_element_type=jnp.float32)
    h = jnp.tanh(h + b1_ref[...])

    # out_proj: h @ W2 (bf16 MXU, f32 accumulate) + b2
    out = jnp.dot(h.astype(jnp.bfloat16), w2_ref[...],
                  preferred_element_type=jnp.float32)
    o_ref[...] = (out + b2_ref[...]).astype(o_ref.dtype)


def prepare_head_params(w1, b1, w2, b2):
    """One-time (model-load-time) packing of head params for the kernel.

    Expects weights in [in, out] layout.  Returns bf16 weights, f32 row-vector
    biases, with the out_proj zero-padded to a lane-dense multiple of 128.
    """
    H = w1.shape[0]
    O = w2.shape[1]
    OP = _round_up(max(O, 1), 128)  # lane-dense output width
    w1_b = w1.astype(jnp.bfloat16)
    b1_r = b1.reshape(1, H).astype(jnp.float32)
    w2_p = jnp.zeros((H, OP), jnp.bfloat16).at[:, :O].set(w2.astype(jnp.bfloat16))
    b2_p = jnp.zeros((1, OP), jnp.float32).at[:, :O].set(b2.astype(jnp.float32))
    return w1_b, b1_r, w2_p, b2_p


@functools.partial(jax.jit, static_argnames=("out_size",))
def roberta_classification_head(features, w1_b, b1_r, w2_p, b2_p, *, out_size):
    """features: [B, S, H]; returns logits [B, out_size] in float32."""
    B, S, H = features.shape
    OP = w2_p.shape[1]

    # Fused CLS gather: view features as [B, S*H]; the (TB, H) block starting
    # at column 0 is exactly features[:, 0, :].  Needs H % 128 == 0 (lane tile).
    if S == 1 or H % 128 == 0:
        x2d = features.reshape(B, S * H)
    else:
        # TODO(synk): fused CLS gather needs H % 128 == 0; fall back to a small
        # wrapper slice (one extra [B, H] HBM round trip) for odd hidden sizes.
        x2d = features[:, 0, :]

    # Batch tile: multiple of 16 (bf16 packing); >= 2 grid steps when B > 16 so
    # both v7x TensorCores get work; capped at 512 (amortizes per-step overhead
    # on v6e/v7x while keeping pipeline buffers tiny vs VMEM).
    if B <= 16:
        TB = B
    else:
        TB = min(512, _round_up((B + 1) // 2, 16))
    grid = (pl.cdiv(B, TB),)

    out = pl.pallas_call(
        _head_kernel,
        out_shape=jax.ShapeDtypeStruct((B, OP), jnp.float32),
        grid_spec=pltpu.PrefetchScalarGridSpec(
            num_scalar_prefetch=0,
            grid=grid,
            in_specs=[
                # x tile: pipelined per batch step (double-buffered by default).
                pl.BlockSpec((TB, H), lambda i: (i, 0)),
                # Resident operands: constant index_map (fetched once) and
                # single-buffered to halve their VMEM footprint.
                pl.BlockSpec((H, H), lambda i: (0, 0),
                             pipeline_mode=pl.Buffered(1)),
                pl.BlockSpec((1, H), lambda i: (0, 0),
                             pipeline_mode=pl.Buffered(1)),
                pl.BlockSpec((H, OP), lambda i: (0, 0),
                             pipeline_mode=pl.Buffered(1)),
                pl.BlockSpec((1, OP), lambda i: (0, 0),
                             pipeline_mode=pl.Buffered(1)),
            ],
            out_specs=pl.BlockSpec((TB, OP), lambda i: (i, 0)),
        ),
        compiler_params=pltpu.CompilerParams(
            dimension_semantics=("parallel",),   # shards batch across TCs on v7x
            vmem_limit_bytes=32 * 1024 * 1024,   # conservative for v7x's 64 MiB
        ),
    )(x2d, w1_b, b1_r, w2_p, b2_p)

    return out[:, :out_size]


def _init_params(key, hidden_size, out_size):
    """Deterministic, PyTorch-Linear-style uniform init; weights stored [in, out]."""
    k1, k2, k3, k4 = jax.random.split(key, 4)
    bound1 = 1.0 / jnp.sqrt(hidden_size)
    w1 = jax.random.uniform(k1, (hidden_size, hidden_size), jnp.float32, -bound1, bound1)
    b1 = jax.random.uniform(k2, (hidden_size,), jnp.float32, -bound1, bound1)
    w2 = jax.random.uniform(k3, (hidden_size, out_size), jnp.float32, -bound1, bound1)
    b2 = jax.random.uniform(k4, (out_size,), jnp.float32, -bound1, bound1)
    return w1, b1, w2, b2


if __name__ == "__main__":
    # Small, module-consistent shapes: batch=2, seq=8, hidden=128, out_size=1.
    # (hidden=128 keeps the CLS gather fused; real RoBERTa H=768/1024 also does.)
    B, S, H, OUT = 2, 8, 128, 1

    key = jax.random.PRNGKey(0)
    kf, kp = jax.random.split(key)
    features = jax.random.normal(kf, (B, S, H), dtype=jnp.float32)
    w1, b1, w2, b2 = _init_params(kp, H, OUT)

    # One-time weight packing (load-time), then the jitted forward.
    w1_b, b1_r, w2_p, b2_p = prepare_head_params(w1, b1, w2, b2)
    logits = roberta_classification_head(features, w1_b, b1_r, w2_p, b2_p,
                                         out_size=OUT)
    logits = jax.block_until_ready(logits)

    # Pure-JAX f32 reference (dropout is identity in eval). bf16 MXU operands
    # give ~1e-2-level deviation, so compare with a loose tolerance.
    x_ref = features[:, 0, :]
    ref = jnp.tanh(x_ref @ w1 + b1) @ w2 + b2
    assert logits.shape == (B, OUT)
    assert jnp.allclose(logits, ref, atol=5e-2, rtol=5e-2)

    print("KERNEL_OK")
</pallas_src>

<mosaic_0001>
module attributes {stable_mosaic.version = 11 : i64} {
  func.func @_head_kernel(%arg0: i32, %arg1: memref<2x128xf32, #tpu.memory_space<vmem>>, %arg2: memref<128x128xbf16, #tpu.memory_space<vmem>>, %arg3: memref<1x128xf32, #tpu.memory_space<vmem>>, %arg4: memref<128x128xbf16, #tpu.memory_space<vmem>>, %arg5: memref<1x128xf32, #tpu.memory_space<vmem>>, %arg6: memref<2x128xf32, #tpu.memory_space<vmem>>) attributes {dimension_semantics = [#tpu.dimension_semantics<parallel>], iteration_bounds = array<i64: 1>, scalar_prefetch = 0 : i64, scratch_operands = 0 : i64, tpu.core_type = #tpu.core_type<tc>, window_params = [{transform_indices = @transform_0, window_bounds = array<i64: 2, 128>}, {pipeline_mode = #tpu.pipeline_mode<synchronous>, transform_indices = @transform_1, window_bounds = array<i64: 128, 128>}, {pipeline_mode = #tpu.pipeline_mode<synchronous>, transform_indices = @transform_2, window_bounds = array<i64: 1, 128>}, {pipeline_mode = #tpu.pipeline_mode<synchronous>, transform_indices = @transform_3, window_bounds = array<i64: 128, 128>}, {pipeline_mode = #tpu.pipeline_mode<synchronous>, transform_indices = @transform_4, window_bounds = array<i64: 1, 128>}, {transform_indices = @transform_5, window_bounds = array<i64: 2, 128>}]} {
    %c0 = arith.constant 0 : index
    %c0_0 = arith.constant 0 : index
    %0 = vector.load %arg1[%c0, %c0_0] : memref<2x128xf32, #tpu.memory_space<vmem>>, vector<2x128xf32>
    %1 = arith.truncf %0 : vector<2x128xf32> to vector<2x128xbf16>
    %c0_1 = arith.constant 0 : index
    %c0_2 = arith.constant 0 : index
    %2 = vector.load %arg2[%c0_1, %c0_2] : memref<128x128xbf16, #tpu.memory_space<vmem>>, vector<128x128xbf16>
    %cst = arith.constant dense<0.000000e+00> : vector<2x128xf32>
    %3 = tpu.matmul %1, %2, %cst {dimension_numbers = #tpu.dot_dimension_numbers<[1], [0], [0], [1], [0, 0, 1, 1], [], []>} : vector<2x128xbf16>, vector<128x128xbf16>, vector<2x128xf32> -> vector<2x128xf32>
    %c0_3 = arith.constant 0 : index
    %c0_4 = arith.constant 0 : index
    %4 = vector.load %arg3[%c0_3, %c0_4] : memref<1x128xf32, #tpu.memory_space<vmem>>, vector<1x128xf32>
    %5 = vector.broadcast %4 : vector<1x128xf32> to vector<2x128xf32>
    %6 = arith.addf %3, %5 : vector<2x128xf32>
    %7 = math.tanh %6 : vector<2x128xf32>
    %8 = arith.truncf %7 : vector<2x128xf32> to vector<2x128xbf16>
    %c0_5 = arith.constant 0 : index
    %c0_6 = arith.constant 0 : index
    %9 = vector.load %arg4[%c0_5, %c0_6] : memref<128x128xbf16, #tpu.memory_space<vmem>>, vector<128x128xbf16>
    %cst_7 = arith.constant dense<0.000000e+00> : vector<2x128xf32>
    %10 = tpu.matmul %8, %9, %cst_7 {dimension_numbers = #tpu.dot_dimension_numbers<[1], [0], [0], [1], [0, 0, 1, 1], [], []>} : vector<2x128xbf16>, vector<128x128xbf16>, vector<2x128xf32> -> vector<2x128xf32>
    %c0_8 = arith.constant 0 : index
    %c0_9 = arith.constant 0 : index
    %11 = vector.load %arg5[%c0_8, %c0_9] : memref<1x128xf32, #tpu.memory_space<vmem>>, vector<1x128xf32>
    %12 = vector.broadcast %11 : vector<1x128xf32> to vector<2x128xf32>
    %13 = arith.addf %10, %12 : vector<2x128xf32>
    %c0_10 = arith.constant 0 : index
    %c0_11 = arith.constant 0 : index
    %14 = vector.load %arg6[%c0_10, %c0_11] : memref<2x128xf32, #tpu.memory_space<vmem>>, vector<2x128xf32>
    tpu.vector_store %arg6[%c0_10, %c0_11], %13 {strides = array<i32>} : memref<2x128xf32, #tpu.memory_space<vmem>>, vector<2x128xf32>,
    return
  }
  func.func @transform_0(%arg0: i32) -> (i32, i32) {
    %c0_i32 = arith.constant 0 : i32
    %c0_i32_0 = arith.constant 0 : i32
    return %arg0, %c0_i32 : i32, i32
  }
  func.func @transform_1(%arg0: i32) -> (i32, i32) {
    %c0_i32 = arith.constant 0 : i32
    %c0_i32_0 = arith.constant 0 : i32
    %c0_i32_1 = arith.constant 0 : i32
    return %c0_i32, %c0_i32_0 : i32, i32
  }
  func.func @transform_2(%arg0: i32) -> (i32, i32) {
    %c0_i32 = arith.constant 0 : i32
    %c0_i32_0 = arith.constant 0 : i32
    %c0_i32_1 = arith.constant 0 : i32
    return %c0_i32, %c0_i32_0 : i32, i32
  }
  func.func @transform_3(%arg0: i32) -> (i32, i32) {
    %c0_i32 = arith.constant 0 : i32
    %c0_i32_0 = arith.constant 0 : i32
    %c0_i32_1 = arith.constant 0 : i32
    return %c0_i32, %c0_i32_0 : i32, i32
  }
  func.func @transform_4(%arg0: i32) -> (i32, i32) {
    %c0_i32 = arith.constant 0 : i32
    %c0_i32_0 = arith.constant 0 : i32
    %c0_i32_1 = arith.constant 0 : i32
    return %c0_i32, %c0_i32_0 : i32, i32
  }
  func.func @transform_5(%arg0: i32) -> (i32, i32) {
    %c0_i32 = arith.constant 0 : i32
    %c0_i32_0 = arith.constant 0 : i32
    return %arg0, %c0_i32 : i32, i32
  }
}

</mosaic_0001>

<bundles_post_ra>
// kernel: roberta_classification_head.1
= control target key start
LH: loop header
LB: loop body
LE: loop exit
PB: predicated region body
PF: predicated region fallthrough
CT: control target
= control target key end

     0   :  { %10 = vsyncpa [#allocation3], 0  ;;  %s417_s0 = inlined_call_operand.vmem [shape: f32[2,1024], index: 0, kind: input, shape index: {}]   ;;  %s418_s1 = inlined_call_operand.hbm [shape: bf16[128,128], index: 1, kind: input, shape index: {}]   ;;  %s419_s2 = inlined_call_operand.vmem [shape: f32[1,128], index: 2, kind: input, shape index: {}]   ;;  %s420_s3 = inlined_call_operand.hbm [shape: bf16[128,128], index: 3, kind: input, shape index: {}]   ;;  %s421_s4 = inlined_call_operand.vmem [shape: f32[1,128], index: 4, kind: input, shape index: {}]   ;;  %s422_s5 = inlined_call_operand.vmem [shape: f32[2,128], index: 5, kind: output, shape index: {}]  }
   0x1   :  { %s18_s20 = sshll.u32 %s418_s1, 4  ;;  %s19_s20 = int_to_ptr.hbm [resolvable:$true] %s18_s20 }
   0x2   :  { %11 = vsyncpa [#allocation5], 0  ;;  %s365_s21 = smov [#allocation2]   ;;  %s33_s25 = sshll.u32 %s420_s3, 4  ;;  %s34_s25 = int_to_ptr.hbm [resolvable:$true] %s33_s25 }
   0x3   :  { %s20_s22 = sshll.u32 %s365_s21, 4  ;;  %s366_s26 = smov 64   ;;  %s21_s22 = int_to_ptr.vmem [resolvable:$true] %s20_s22 }
   0x4   :  { %s367_s27 = smov 4   ;;  %s368_s28 = smov [#allocation4]  }
   0x5   :  { %26 = dma.hbm_to_vmem [thread:$0]  %s19_s20, 1024, %s21_s22, [#allocation3], %s366_s26, %s366_s26, %s367_s27  }
   0x6   :  { %s35_s29 = sshll.u32 %s368_s28, 4  ;;  %s36_s29 = int_to_ptr.vmem [resolvable:$true] %s35_s29 }
   0x7   :  { %41 = dma.hbm_to_vmem [thread:$0]  %s34_s25, 1024, %s36_s29, [#allocation5], %s366_s26, %s366_s26, %s367_s27  }
   0x8   :  { %361 = dma.done.wait [#allocation3], 1024  }
   0x9   :  { %362 = vsyncadd [#allocation3], 4294966272 }
   0xa   :  { %363 = dma.done.wait [#allocation5], 1024  }
   0xb   :  { %364 = vsyncadd [#allocation5], 4294966272  ;;  %v296_v0 = vld [vmem:[#allocation2 + $0x38] sm:$0xff]  ;;  %v295_v1 = vld [vmem:[#allocation2 + $0x30] sm:$0xff] }
   0xc   :  { %122 = vmatpush.bf16.msra.mxu0 %v296_v0  ;;  %v304_v2 = vld [vmem:[#allocation4 + $0x38] sm:$0xff]  ;;  %v303_v3 = vld [vmem:[#allocation4 + $0x30] sm:$0xff]  ;;  %v294_v4 = vld [vmem:[#allocation2 + $0x28] sm:$0xff] }
   0xd   :  { %205 = vmatpush.bf16.msra.mxu1 %v304_v2  ;;  %v302_v5 = vld [vmem:[#allocation4 + $0x28] sm:$0xff]  ;;  %v293_v6 = vld [vmem:[#allocation2 + $0x20] sm:$0xff]  ;;  %v292_v8 = vld [vmem:[#allocation2 + $0x18] sm:$0xff] }
   0xe   :  { %v301_v7 = vld [vmem:[#allocation4 + $0x20] sm:$0xff]  ;;  %v300_v9 = vld [vmem:[#allocation4 + $0x18] sm:$0xff]  ;;  %v291_v10 = vld [vmem:[#allocation2 + $0x10] sm:$0xff] }
   0xf   :  { %v290_v11 = vld [vmem:[#allocation2 + $0x8] sm:$0xff]  ;;  %v289_v12 = vld [vmem:[#allocation2] sm:$0xff]  ;;  %v299_v15 = vld [vmem:[#allocation4 + $0x10] sm:$0xff] }
  0x10   :  { %123 = vmatpush.bf16.msra.mxu0 %v295_v1  ;;  %v52_v13 = vld [vmem:[%s417_s0] sm:$0x3]  ;;  %v298_v16 = vld [vmem:[#allocation4 + $0x8] sm:$0xff] }
  0x11   :  { %206 = vmatpush.bf16.msra.mxu1 %v303_v3  ;;  %v53_v14 = vpack.c.bf16 %v52_v13, %v52_v13  ;;  %v297_v17 = vld [vmem:[#allocation4] sm:$0xff] }
  0x12   :  { %v309_v18 = vld [vmem:[%s419_s2] ss:$0 sm:$0xff] }
  0x13   :  { %v310_v24 = vld [vmem:[%s421_s4] ss:$0 sm:$0xff] }
  0x14   :  { %124 = vmatpush.bf16.msra.mxu0 %v294_v4 }
  0x15   :  { %207 = vmatpush.bf16.msra.mxu1 %v302_v5 }
  0x18   :  { %125 = vmatpush.bf16.msra.mxu0 %v293_v6 }
  0x19   :  { %208 = vmatpush.bf16.msra.mxu1 %v301_v7 }
  0x1c   :  { %126 = vmatpush.bf16.msra.mxu0 %v292_v8 }
  0x1d   :  { %209 = vmatpush.bf16.msra.mxu1 %v300_v9 }
  0x20   :  { %127 = vmatpush.bf16.msra.mxu0 %v291_v10 }
  0x21   :  { %210 = vmatpush.bf16.msra.mxu1 %v299_v15 }
  0x24   :  { %128 = vmatpush.bf16.msra.mxu0 %v290_v11 }
  0x25   :  { %211 = vmatpush.bf16.msra.mxu1 %v298_v16 }
  0x28   :  { %129 = vmatpush.bf16.msra.mxu0 %v289_v12 }
  0x29   :  { %212 = vmatpush.bf16.msra.mxu1 %v297_v17 }
  0x2b   :  { %130 = vmatmul.bf16.vlgmr.msra.gmra.mxu0 %v53_v14 }
  0xa8   :  { %v131_v19 = vpop.f32.mrf.mxu0 }
  0xa9   :  { %v132_v20 = vadd.f32 %v309_v18, %v131_v19 }
  0xab   :  { %311 = vtanh.f32 %v132_v20 }
  0xb0   :  { %v133_v21 = vpop.f32.mrf.mxu0 }
  0xb1   :  { %v312_v22 = vpop.eup %311 }
  0xb2   :  { %v136_v23 = vpack.c.bf16 %v312_v22, %v312_v22 }
  0xb4   :  { %213 = vmatmul.bf16.vlgmr.msra.gmra.mxu1 %v136_v23 }
 0x131   :  { %v214_v25 = vpop.f32.mrf.mxu1 }
 0x132   :  { %v215_v26 = vadd.f32 %v310_v24, %v214_v25 }
 0x134   :  { %218 = vst [vmem:[%s422_s5] sm:$0x3] %v215_v26 }
 0x139   :  { %v216_v27 = vpop.f32.mrf.mxu1 }
 0x13a   :  { %223 = vsyncpa [#allocation3], 1 }
 0x13b   :  { %224 = vsyncpa [#allocation5], 1 }

</bundles_post_ra>
